<compile_context>
chip_gen: v6e
topology: v6e:2x2x1
jax: 0.10.0
libtpu: 0.0.40
codegen_flags: <defaults>
</compile_context>

<pallas_src>
import functools
import math

import jax
import jax.numpy as jnp
from jax import lax
from jax.experimental import pallas as pl
from jax.experimental.pallas import tpu as pltpu


# ---------------------------------------------------------------------------
# Kernel
# ---------------------------------------------------------------------------
def _qkv_attn_kernel(q_ref, k_ref, v_ref, o_ref, *, nb, hb, ch, scale,
                     exp_dtype, approx_recip):
    # q_ref / o_ref: (nb, hb*ch, tq)   k_ref / v_ref: (nb, hb*ch, T)
    tq = q_ref.shape[-1]
    T = k_ref.shape[-1]
    B = nb * hb

    # Fold both scale multiplies into one: (q*s)·(k*s) == (q*s^2)·k.
    q = (q_ref[...] * (scale * scale)).reshape(B, ch, tq)   # input dtype
    k = k_ref[...].reshape(B, ch, T)
    v = v_ref[...].reshape(B, ch, T)

    # Transposed logits: wT[b, s, t] = sum_c k[b, c, s] * q[b, c, t]
    # Lane dim of the result is the query tile -> lane-dense everywhere.
    wT = lax.dot_general(
        k, q,
        dimension_numbers=(((1,), (1,)), ((0,), (0,))),
        preferred_element_type=jnp.float32,
    )                                                        # (B, T, tq) f32

    # Softmax over the key axis (axis=1); normalization deferred past the
    # PV matmul (T reciprocals + ch*tq mults instead of T*tq divides).
    m = jnp.max(wT, axis=1, keepdims=True)                   # (B, 1, tq) f32
    e = jnp.exp((wT - m).astype(exp_dtype))                  # (B, T, tq)
    l = jnp.sum(e.astype(jnp.float32), axis=1, keepdims=True)  # (B, 1, tq) f32
    p = e.astype(v.dtype)                                    # MXU-native dtype

    # a[b, c, t] = sum_s v[b, c, s] * p[b, s, t]  -> already channels-major,
    # no epilogue transposes, standard (ch,T)x(T,tq) MXU contraction.
    a = lax.dot_general(
        v, p,
        dimension_numbers=(((2,), (1,)), ((0,), (0,))),
        preferred_element_type=jnp.float32,
    )                                                        # (B, ch, tq) f32

    a = a * pl.reciprocal(l, approx=approx_recip)            # broadcast over ch
    o_ref[...] = a.reshape(nb, hb * ch, tq).astype(o_ref.dtype)


# ---------------------------------------------------------------------------
# Tiling heuristics
# ---------------------------------------------------------------------------
def _vmem_capacity_bytes():
    try:
        cap = pltpu.get_tpu_info().vmem_capacity_bytes
        if cap:
            return int(cap)
    except Exception:
        pass
    return 64 * 1024 * 1024          # conservative: v7x per-TensorCore VMEM


def _working_set_bytes(nb, hb, tq, T, ch, in_dtype, out_dtype):
    """Rough per-grid-step VMEM footprint, counting everything live at once."""
    isz = jnp.dtype(in_dtype).itemsize
    osz = jnp.dtype(out_dtype).itemsize
    esz = isz if isz < 4 else 4                     # exp dtype size
    B = nb * hb
    logits = B * T * tq * (4 + esz)                 # f32 logits + exp(w - m)
    if esz != isz:
        logits += B * T * tq * isz                  # cast of p to MXU dtype
    acc = B * ch * tq * 4                           # f32 PV result
    vecs = B * ch * (tq + 2 * T) * isz              # scaled q + k + v copies
    io = 2 * (B * ch * (tq + 2 * T) * isz           # double-buffered q/k/v blocks
              + B * ch * tq * osz)                  # double-buffered out block
    return logits + acc + vecs + io


def _pick_tiling(N, H, ch, T, in_dtype, out_dtype, budget_bytes, *,
                 head_block=None, batch_block=None, q_tile=None):
    packing = 32 // jnp.dtype(in_dtype).itemsize    # sublane packing: 8/16/32

    if head_block is not None:
        head_cands = [head_block]
    else:
        head_cands = [h for h in range(H, 0, -1) if H % h == 0]
        if ch % packing != 0:
            # Splitting hb*ch -> (hb, ch) would cross sublane tiles and force
            # relayout copies; keep one head per step (reshape is then a no-op).
            head_cands = [1]
        head_cands = [h for h in head_cands if (h * ch) % 8 == 0] or [1]

    if q_tile is not None:
        tq_cands = [q_tile]
    else:
        tq_cands = [T] + [t for t in (2048, 1024, 512, 256, 128)
                          if t < T and T % t == 0]

    if batch_block is not None:
        nb_cands = [batch_block]
    elif T < 128:
        # Short sequences: lane width < 128 -> batch several batch elements per
        # step to amortize per-step overhead and grow DMAs.
        nb_cands = [n for n in range(N, 0, -1) if N % n == 0]
    else:
        nb_cands = [1]

    best = None
    for hb in head_cands:
        for tq in tq_cands:
            for nb in nb_cands:
                if _working_set_bytes(nb, hb, tq, T, ch,
                                      in_dtype, out_dtype) > budget_bytes:
                    continue
                steps = (N // nb) * (H // hb) * (T // tq)
                key = (steps, -tq, -hb, -nb)        # fewest steps, then wide tq
                if best is None or key < best[0]:
                    best = (key, (nb, hb, tq))
    if best is not None:
        return best[1]
    # Nothing fits the budget: smallest tiles, let the compiler cope.
    return min(nb_cands), min(head_cands), min(tq_cands)


# ---------------------------------------------------------------------------
# Wrapper
# ---------------------------------------------------------------------------
def qkv_attention(qkv, n_heads, *, head_block=None, batch_block=None,
                  q_tile=None):
    """Pallas equivalent of QKVAttention.forward.

    :param qkv: [N, 3*H*C, T]
    :return:    [N, H*C, T]
    """
    N, width, T = qkv.shape
    assert width % (3 * n_heads) == 0
    H = n_heads
    ch = width // (3 * H)
    scale = 1.0 / math.sqrt(math.sqrt(ch))
    in_dtype = qkv.dtype

    # Generation-aware VMEM sizing: never request the full physical VMEM
    # (v7x has only 64 MiB/TC); budget the working set below the limit so the
    # input/output pipeline keeps double-buffering.
    vmem_cap = _vmem_capacity_bytes()
    vmem_limit = int(vmem_cap * 0.85)
    budget = int(vmem_limit * 0.8)

    nb, hb, tq = _pick_tiling(N, H, ch, T, in_dtype, in_dtype, budget,
                              head_block=head_block, batch_block=batch_block,
                              q_tile=q_tile)

    assert H % hb == 0 and N % nb == 0 and T % tq == 0
    assert (hb * ch) % 8 == 0, (
        f"head-block channel width {hb * ch} is not sublane aligned")
    assert tq == T or tq % 128 == 0

    G = H // hb                              # head groups
    NB = N // nb                             # batch blocks
    TQ = T // tq                             # query tiles

    # 16-bit inputs: exp in the input dtype (bf16 EUP on v6e/v7x) and approx
    # reciprocal; f32 inputs keep full precision for strict reference parity.
    exp_dtype = in_dtype if jnp.dtype(in_dtype).itemsize < 4 else jnp.float32
    approx_recip = jnp.dtype(in_dtype).itemsize < 4

    qo_blk = (nb, hb * ch, tq)
    kv_blk = (nb, hb * ch, T)
    # qkv channel layout: [q heads | k heads | v heads], each H*ch wide.
    # Channel block index g selects window [g*hb*ch, (g+1)*hb*ch).
    q_spec = pl.BlockSpec(qo_blk, lambda n, g, t: (n, g, t))
    k_spec = pl.BlockSpec(kv_blk, lambda n, g, t, G=G: (n, G + g, 0))
    v_spec = pl.BlockSpec(kv_blk, lambda n, g, t, G=G: (n, 2 * G + g, 0))
    o_spec = pl.BlockSpec(qo_blk, lambda n, g, t: (n, g, t))

    out = pl.pallas_call(
        functools.partial(_qkv_attn_kernel, nb=nb, hb=hb, ch=ch, scale=scale,
                          exp_dtype=exp_dtype, approx_recip=approx_recip),
        out_shape=jax.ShapeDtypeStruct((N, H * ch, T), qkv.dtype),
        grid_spec=pltpu.PrefetchScalarGridSpec(
            num_scalar_prefetch=0,
            grid=(NB, G, TQ),                # tq innermost: k/v blocks resident
            in_specs=[q_spec, k_spec, v_spec],
            out_specs=o_spec,
        ),
        compiler_params=pltpu.CompilerParams(
            dimension_semantics=("parallel", "parallel", "parallel"),
            vmem_limit_bytes=vmem_limit,
        ),
    )(qkv, qkv, qkv)                         # same array, three channel views

    return out                               # already [N, H*C, T]


# ---------------------------------------------------------------------------
# Pure-JAX reference (mirrors the PyTorch code exactly)
# ---------------------------------------------------------------------------
def _qkv_attention_ref(qkv, n_heads):
    N, width, T = qkv.shape
    ch = width // (3 * n_heads)
    q, k, v = jnp.split(qkv, 3, axis=1)
    scale = 1.0 / math.sqrt(math.sqrt(ch))
    qh = (q * scale).reshape(N * n_heads, ch, T)
    kh = (k * scale).reshape(N * n_heads, ch, T)
    vh = v.reshape(N * n_heads, ch, T)
    w = jnp.einsum("bct,bcs->bts", qh, kh)
    w = jax.nn.softmax(w.astype(jnp.float32), axis=-1).astype(w.dtype)
    a = jnp.einsum("bts,bcs->bct", w, vh)
    return a.reshape(N, -1, T)


if __name__ == "__main__":
    n_heads = 2
    N, ch, T = 2, 8, 16                      # width = 3 * H * C = 48
    width = 3 * n_heads * ch

    key = jax.random.PRNGKey(0)
    qkv = jax.random.normal(key, (N, width, T), dtype=jnp.float32)

    ref = _qkv_attention_ref(qkv, n_heads)

    # Auto tiling path (batch + head batched in one grid step).
    out = jax.block_until_ready(qkv_attention(qkv, n_heads))
    assert out.shape == (N, n_heads * ch, T)
    assert jnp.allclose(out, ref, atol=1e-4, rtol=1e-4), "mismatch (auto tiling)"

    # Single-head-per-step path (exercises G > 1 channel index maps).
    out1 = jax.block_until_ready(qkv_attention(qkv, n_heads, head_block=1))
    assert jnp.allclose(out1, ref, atol=1e-4, rtol=1e-4), "mismatch (hb=1)"

    # bf16 path (exercises bf16 exp + approx reciprocal + packing-aware hb).
    qkv_bf = qkv.astype(jnp.bfloat16)
    ref_bf = _qkv_attention_ref(qkv_bf.astype(jnp.float32), n_heads)
    out_bf = jax.block_until_ready(qkv_attention(qkv_bf, n_heads))
    assert jnp.allclose(out_bf.astype(jnp.float32), ref_bf,
                        atol=5e-2, rtol=5e-2), "mismatch (bf16)"

    print("KERNEL_OK")
</pallas_src>

<mosaic_0001>
module attributes {stable_mosaic.version = 11 : i64} {
  func.func @_qkv_attn_kernel(%arg0: i32, %arg1: i32, %arg2: i32, %arg3: memref<2x16x16xf32, #tpu.memory_space<vmem>>, %arg4: memref<2x16x16xf32, #tpu.memory_space<vmem>>, %arg5: memref<2x16x16xf32, #tpu.memory_space<vmem>>, %arg6: memref<2x16x16xf32, #tpu.memory_space<vmem>>) attributes {dimension_semantics = [#tpu.dimension_semantics<parallel>, #tpu.dimension_semantics<parallel>, #tpu.dimension_semantics<parallel>], iteration_bounds = array<i64: 1, 1, 1>, scalar_prefetch = 0 : i64, scratch_operands = 0 : i64, tpu.core_type = #tpu.core_type<tc>, window_params = [{transform_indices = @transform_0, window_bounds = array<i64: 2, 16, 16>}, {transform_indices = @transform_1, window_bounds = array<i64: 2, 16, 16>}, {transform_indices = @transform_2, window_bounds = array<i64: 2, 16, 16>}, {transform_indices = @transform_3, window_bounds = array<i64: 2, 16, 16>}]} {
    %c0 = arith.constant 0 : index
    %c0_0 = arith.constant 0 : index
    %c0_1 = arith.constant 0 : index
    %0 = vector.load %arg3[%c0, %c0_0, %c0_1] : memref<2x16x16xf32, #tpu.memory_space<vmem>>, vector<2x16x16xf32>
    %cst = arith.constant 0.353553385 : f32
    %1 = vector.broadcast %cst : f32 to vector<2x16x16xf32>
    %2 = arith.mulf %0, %1 : vector<2x16x16xf32>
    %3 = vector.shape_cast %2 : vector<2x16x16xf32> to vector<4x8x16xf32>
    %c0_2 = arith.constant 0 : index
    %c0_3 = arith.constant 0 : index
    %c0_4 = arith.constant 0 : index
    %4 = vector.load %arg4[%c0_2, %c0_3, %c0_4] : memref<2x16x16xf32, #tpu.memory_space<vmem>>, vector<2x16x16xf32>
    %5 = vector.shape_cast %4 : vector<2x16x16xf32> to vector<4x8x16xf32>
    %c0_5 = arith.constant 0 : index
    %c0_6 = arith.constant 0 : index
    %c0_7 = arith.constant 0 : index
    %6 = vector.load %arg5[%c0_5, %c0_6, %c0_7] : memref<2x16x16xf32, #tpu.memory_space<vmem>>, vector<2x16x16xf32>
    %7 = vector.shape_cast %6 : vector<2x16x16xf32> to vector<4x8x16xf32>
    %cst_8 = arith.constant dense<0.000000e+00> : vector<4x16x16xf32>
    %8 = tpu.matmul %5, %3, %cst_8 {dimension_numbers = #tpu.dot_dimension_numbers<[1], [1], [2], [2], [0, 0, 0, 2, 1, 2], [0], [0]>} : vector<4x8x16xf32>, vector<4x8x16xf32>, vector<4x16x16xf32> -> vector<4x16x16xf32>
    %cst_9 = arith.constant dense<0xFF800000> : vector<4x16xf32>
    %9 = vector.multi_reduction <maximumf>, %8, %cst_9 [1] : vector<4x16x16xf32> to vector<4x16xf32>
    %10 = vector.shape_cast %9 : vector<4x16xf32> to vector<4x1x16xf32>
    %11 = vector.broadcast %10 : vector<4x1x16xf32> to vector<4x16x16xf32>
    %12 = arith.subf %8, %11 : vector<4x16x16xf32>
    %13 = math.exp %12 : vector<4x16x16xf32>
    %cst_10 = arith.constant dense<0.000000e+00> : vector<4x16xf32>
    %14 = vector.multi_reduction <add>, %13, %cst_10 [1] : vector<4x16x16xf32> to vector<4x16xf32>
    %15 = vector.shape_cast %14 : vector<4x16xf32> to vector<4x1x16xf32>
    %cst_11 = arith.constant dense<0.000000e+00> : vector<4x8x16xf32>
    %16 = tpu.matmul %7, %13, %cst_11 {dimension_numbers = #tpu.dot_dimension_numbers<[2], [1], [1], [2], [0, 0, 0, 1, 1, 2], [0], [0]>} : vector<4x8x16xf32>, vector<4x16x16xf32>, vector<4x8x16xf32> -> vector<4x8x16xf32>
    %17 = tpu.reciprocal %15 : vector<4x1x16xf32> -> vector<4x1x16xf32>
    %18 = vector.broadcast %17 : vector<4x1x16xf32> to vector<4x8x16xf32>
    %19 = arith.mulf %16, %18 : vector<4x8x16xf32>
    %20 = vector.shape_cast %19 : vector<4x8x16xf32> to vector<2x16x16xf32>
    %c0_12 = arith.constant 0 : index
    %c0_13 = arith.constant 0 : index
    %c0_14 = arith.constant 0 : index
    %21 = vector.load %arg6[%c0_12, %c0_13, %c0_14] : memref<2x16x16xf32, #tpu.memory_space<vmem>>, vector<2x16x16xf32>
    tpu.vector_store %arg6[%c0_12, %c0_13, %c0_14], %20 {strides = array<i32>} : memref<2x16x16xf32, #tpu.memory_space<vmem>>, vector<2x16x16xf32>,
    return
  }
  func.func @transform_0(%arg0: i32, %arg1: i32, %arg2: i32) -> (i32, i32, i32) {
    %c0_i32 = arith.constant 0 : i32
    return %arg0, %arg1, %arg2 : i32, i32, i32
  }
  func.func @transform_1(%arg0: i32, %arg1: i32, %arg2: i32) -> (i32, i32, i32) {
    %c1_i32 = arith.constant 1 : i32
    %0 = arith.addi %c1_i32, %arg1 : i32
    %c0_i32 = arith.constant 0 : i32
    %c0_i32_0 = arith.constant 0 : i32
    return %arg0, %0, %c0_i32 : i32, i32, i32
  }
  func.func @transform_2(%arg0: i32, %arg1: i32, %arg2: i32) -> (i32, i32, i32) {
    %c2_i32 = arith.constant 2 : i32
    %0 = arith.addi %c2_i32, %arg1 : i32
    %c0_i32 = arith.constant 0 : i32
    %c0_i32_0 = arith.constant 0 : i32
    return %arg0, %0, %c0_i32 : i32, i32, i32
  }
  func.func @transform_3(%arg0: i32, %arg1: i32, %arg2: i32) -> (i32, i32, i32) {
    %c0_i32 = arith.constant 0 : i32
    return %arg0, %arg1, %arg2 : i32, i32, i32
  }
}

</mosaic_0001>

<bundles_post_ra>
// kernel: tpu_custom_call.1
= control target key start
LH: loop header
LB: loop body
LE: loop exit
PB: predicated region body
PF: predicated region fallthrough
CT: control target
= control target key end

     0   :  { %s1323_s0 = inlined_call_operand.vmem [shape: f32[2,48,16], index: 0, kind: input, shape index: {}]   ;;  %s1324_s1 = inlined_call_operand.vmem [shape: f32[2,48,16], index: 1, kind: input, shape index: {}]   ;;  %s1325_s2 = inlined_call_operand.vmem [shape: f32[2,48,16], index: 2, kind: input, shape index: {}]   ;;  %s1326_s3 = inlined_call_operand.hbm [shape: f32[2,16,16], index: 3, kind: output, shape index: {}]  }
   0x1   :  { %v1068_v0 = vld [vmem:[%s1324_s1 + $0x10] sm:$0xff]  ;;  %v1070_v1 = vld [vmem:[%s1324_s1 + $0x40] sm:$0xff] }
   0x2   :  { %184 = vxpose.xlu0.b32.start.end [1/1] (short) (narrow) %v1068_v0, 16  ;;  %411 = vxpose.xlu1.b32.start.end [1/1] (short) (narrow) %v1070_v1, 16  ;;  %v45_v2 = vld [vmem:[%s1323_s0] sm:$0xff]  ;;  %v49_v3 = vld [vmem:[%s1323_s0 + $0x30] sm:$0xff] }
   0x3   :  { %v172_v4 = vmul.f32 0.35355338, %v45_v2 }
   0x4   :  { %8 = vsyncpa [#allocation6], 0  ;;  %v1069_v5 = vld [vmem:[%s1324_s1 + $0x18] sm:$0xff]  ;;  %v1071_v6 = vld [vmem:[%s1324_s1 + $0x48] sm:$0xff]  ;;  %v174_v7 = vmul.f32 0.35355338, %v49_v3 }
   0x5   :  { %1112 = vmatprep.subr.mxu0 %v172_v4  ;;  %v47_v8 = vld [vmem:[%s1323_s0 + $0x8] sm:$0xff]  ;;  %v51_v10 = vld [vmem:[%s1323_s0 + $0x38] sm:$0xff]  ;;  %vm216_vm0 = vcmask 64512   ;;  %v1211_v20 = vmov 0.0   ;;  %vm1212_vm1 = vmmov 0   ;;  %vm637_vm2 = vcmask 130048  }
   0x6   :  { %1113 = vmatpush3.msra.mxu0 %v172_v4  ;;  %v173_v9 = vmul.f32 0.35355338, %v47_v8  ;;  %v175_v11 = vmul.f32 0.35355338, %v51_v10 }
   0x7   :  { %298 = vxpose.xlu0.b32.start.end [1/1] (short) (narrow) %v1069_v5, 16  ;;  %524 = vxpose.xlu1.b32.start.end [1/1] (short) (narrow) %v1071_v6, 16 }
   0x8   :  { %1122 = vmatprep.subr.mxu0 %v174_v7  ;;  %1117 = vmatprep.subr.mxu1 %v173_v9 }
   0x9   :  { %1118 = vmatpush3.msra.mxu1 %v173_v9 }
   0xa   :  { %1127 = vmatprep.subr.mxu1 %v175_v11 }
  0x7e   :  { %v200_v12 = vpop.trf.xlu0  ;;  %v427_v13 = vpop.trf.xlu1 }
  0x7f   :  { %1114 = vmatprep.mubr.msk.f32.mxu0 %vm216_vm0, %v200_v12 }
  0x82   :  { %v201_v14 = vpop.trf.xlu0  ;;  %v428_v15 = vpop.trf.xlu1 }
  0x83   :  { %1115 = vmatmul.mubr.msk.f32.vlgmr.msra.gmra.mxu0 %vm216_vm0, %v201_v14 }
  0x84   :  { %1124 = vmatprep.mubr.msk.f32.mxu0 %vm216_vm0, %v427_v13  ;;  %1123 = vmatpush3.msra.mxu0 %v174_v7 }
  0x85   :  { %1132 = vmatprep.subr.mxu0 %v1211_v20 }
  0x86   :  { %v314_v16 = vpop.trf.xlu0  ;;  %v540_v17 = vpop.trf.xlu1 }
  0x87   :  { %1119 = vmatprep.mubr.msk.f32.mxu1 %vm216_vm0, %v314_v16  ;;  %1125 = vmatmul.mubr.msk.f32.vlgmr.msra.gmra.mxu0 %vm216_vm0, %v428_v15 }
  0x88   :  { %1136 = vmatprep.mubr.msk.f32.mxu0 %vm1212_vm1, %v1211_v20 }
  0x8a   :  { %v315_v18 = vpop.trf.xlu0  ;;  %v541_v19 = vpop.trf.xlu1 }
  0x8b   :  { %1120 = vmatmul.mubr.msk.f32.vlgmr.msra.gmra.mxu1 %vm216_vm0, %v315_v18 }
  0x8c   :  { %1128 = vmatpush3.msra.mxu1 %v175_v11  ;;  %1129 = vmatprep.mubr.msk.f32.mxu1 %vm216_vm0, %v540_v17 }
  0x8d   :  { %1139 = vmatprep.subr.mxu1 %v1211_v20 }
  0x8f   :  { %1130 = vmatmul.mubr.msk.f32.vlgmr.msra.gmra.mxu1 %vm216_vm0, %v541_v19 }
  0x90   :  { %1143 = vmatprep.mubr.msk.f32.mxu1 %vm1212_vm1, %v1211_v20 }
 0x143   :  { %v1116_v21 = vpop.f32.mrf.mxu0 }
 0x144   :  { %v639_v23 = vsel %vm637_vm2, %v1116_v21, -inf }
 0x145   :  { %v289_v22 = vpop.f32.mrf.mxu0 }
 0x146   :  { %v638_v24 = vsel %vm637_vm2, %v289_v22, -inf }
 0x147   :  { %v640_v25 = vmax.f32 %v638_v24, %v639_v23  ;;  %v1126_v26 = vpop.f32.mrf.mxu0 }
 0x148   :  { %v657_v29 = vsel %vm637_vm2, %v1126_v26, -inf }
 0x149   :  { %v641_v27 = vrot.slane %v640_v25, 4  ;;  %v515_v28 = vpop.f32.mrf.mxu0 }
 0x14a   :  { %v656_v30 = vsel %vm637_vm2, %v515_v28, -inf }
 0x14b   :  { %v642_v31 = vmax.f32 %v640_v25, %v641_v27  ;;  %v658_v32 = vmax.f32 %v656_v30, %v657_v29  ;;  %v1121_v33 = vpop.f32.mrf.mxu1 }
 0x14c   :  { %v648_v37 = vsel %vm637_vm2, %v1121_v33, -inf }
 0x14d   :  { %v643_v34 = vrot.slane %v642_v31, 2  ;;  %v659_v35 = vrot.slane %v658_v32, 4  ;;  %v402_v36 = vpop.f32.mrf.mxu1 }
 0x14e   :  { %v647_v38 = vsel %vm637_vm2, %v402_v36, -inf }
 0x14f   :  { %v644_v39 = vmax.f32 %v642_v31, %v643_v34  ;;  %v660_v40 = vmax.f32 %v658_v32, %v659_v35  ;;  %v649_v41 = vmax.f32 %v647_v38, %v648_v37  ;;  %v1131_v42 = vpop.f32.mrf.mxu1  ;;  %v1073_v34 = vld [vmem:[%s1325_s2 + $0x28] sm:$0xff] }
 0x150   :  { %v666_v47 = vsel %vm637_vm2, %v1131_v42, -inf }
 0x151   :  { %v645_v43 = vrot.slane %v644_v39, 1  ;;  %v661_v44 = vrot.slane %v660_v40, 2  ;;  %v650_v45 = vrot.slane %v649_v41, 4  ;;  %v628_v46 = vpop.f32.mrf.mxu1 }
 0x152   :  { %v665_v48 = vsel %vm637_vm2, %v628_v46, -inf }
 0x153   :  { %v646_v49 = vmax.f32 %v644_v39, %v645_v43  ;;  %v662_v50 = vmax.f32 %v660_v40, %v661_v44  ;;  %v651_v51 = vmax.f32 %v649_v41, %v650_v45  ;;  %v667_v52 = vmax.f32 %v665_v48, %v666_v47  ;;  %v1075_v40 = vld [vmem:[%s1325_s2 + $0x58] sm:$0xff] }
 0x155   :  { %v674_v53 = vsub.f32 %v289_v22, %v646_v49  ;;  %v675_v54 = vsub.f32 %v1116_v21, %v646_v49  ;;  %v663_v55 = vrot.slane %v662_v50, 1  ;;  %v652_v56 = vrot.slane %v651_v51, 2  ;;  %v1072_v22 = vld [vmem:[%s1325_s2 + $0x20] sm:$0xff] }
 0x156   :  { %v668_v57 = vrot.slane %v667_v52, 4 }
 0x157   :  { %v682_v58 = vmul.f32 1.442695, %v674_v53  ;;  %v684_v59 = vmul.f32 1.442695, %v675_v54  ;;  %v664_v60 = vmax.f32 %v662_v50, %v663_v55  ;;  %v653_v61 = vmax.f32 %v651_v51, %v652_v56 }
 0x158   :  { %v669_v62 = vmax.f32 %v667_v52, %v668_v57 }
 0x159   :  { %1165 = vpow2.f32 %v682_v58  ;;  %v678_v63 = vsub.f32 %v515_v28, %v664_v60  ;;  %v679_v0 = vsub.f32 %v1126_v26, %v664_v60  ;;  %v654_v1 = vrot.slane %v653_v61, 1  ;;  %v1074_v28 = vld [vmem:[%s1325_s2 + $0x50] sm:$0xff]  ;;  %s1213_s2 = smov [#allocation5]  }
 0x15a   :  { %1167 = vpow2.f32 %v684_v59  ;;  %v670_v2 = vrot.slane %v669_v62, 2  ;;  %s1043_s7 = sshll.u32 %s1213_s2, 4  ;;  %s1044_s7 = int_to_ptr.vmem [resolvable:$true] %s1043_s7 }
 0x15b   :  { %v690_v3 = vmul.f32 1.442695, %v678_v63  ;;  %v692_v4 = vmul.f32 1.442695, %v679_v0  ;;  %v655_v5 = vmax.f32 %v653_v61, %v654_v1  ;;  %s1189_s8 = scalar_lea.vmem %s1044_s7, 512  ;;  %p1194_p1 = scmp.lt.s32.totalorder %s1044_s7, %s1044_s7 }
 0x15c   :  { %v671_v6 = vmax.f32 %v669_v62, %v670_v2  ;;  %p1190_p0 = scmp.ne.s32.totalorder %s1044_s7, %s1189_s8  ;;  %p1195_p2 = scmp.lt.s32.totalorder %s1189_s8, %s1189_s8 }
 0x15d   :  { %1169 = vpow2.f32 %v690_v3  ;;  %v676_v7 = vsub.f32 %v402_v36, %v655_v5  ;;  %v677_v8 = vsub.f32 %v1121_v33, %v655_v5 }
 0x15e   :  { %1171 = vpow2.f32 %v692_v4  ;;  %v672_v9 = vrot.slane %v671_v6, 1  ;;  %p1196_p3 = por %p1195_p2, %p1194_p1 }
 0x15f   :  { %v686_v10 = vmul.f32 1.442695, %v676_v7  ;;  %v688_v11 = vmul.f32 1.442695, %v677_v8 }
 0x160   :  { %v673_v12 = vmax.f32 %v671_v6, %v672_v9  ;;  %p1197_p4 = pnand %p1196_p3, %p1190_p0 }
 0x161   :  { %1173 = vpow2.f32 %v686_v10 }
 0x162   :  { %1175 = vpow2.f32 %v688_v11  ;;  %v680_v13 = vsub.f32 %v628_v46, %v673_v12  ;;  %v681_v14 = vsub.f32 %v1131_v42, %v673_v12 }
 0x164   :  { %v694_v15 = vmul.f32 1.442695, %v680_v13  ;;  %v696_v16 = vmul.f32 1.442695, %v681_v14 }
 0x166   :  { %v1166_v17 = vpop.eup %1165  ;;  %1177 = vpow2.f32 %v694_v15 }
 0x167   :  { %v1168_v18 = vpop.eup %1167  ;;  %v698_v19 = vsel %vm637_vm2, %v1166_v17, 0.0  ;;  %1179 = vpow2.f32 %v696_v16 }
 0x168   :  { %v699_v21 = vsel %vm637_vm2, %v1168_v18, 0.0  ;;  %1133 = vmatpush3.msra.mxu0 %v1168_v18 }
 0x169   :  { %v700_v23 = vadd.f32 %v699_v21, %v698_v19  ;;  %1134 = vmatprep.subr.mxu0 %v1211_v20 }
 0x16a   :  { %v1170_v24 = vpop.eup %1169  ;;  %1135 = vmatpush3.msra.mxu0 %v1166_v17 }
 0x16b   :  { %v1172_v25 = vpop.eup %1171  ;;  %v716_v26 = vsel %vm637_vm2, %v1170_v24, 0.0  ;;  %1137 = vmatmul.mubr.msk.f32.vlgmr.msra.gmra.mxu0 %vm637_vm2, %v1072_v22  ;;  %1146 = vmatprep.subr.mxu0 %v1211_v20  ;;  %v701_v42 = vrot.slane %v700_v23, 4 }
 0x16c   :  { %v717_v27 = vsel %vm637_vm2, %v1172_v25, 0.0  ;;  %1147 = vmatpush3.msra.mxu0 %v1172_v25  ;;  %1150 = vmatprep.mubr.msk.f32.mxu0 %vm1212_vm1, %v1211_v20 }
 0x16d   :  { %v718_v29 = vadd.f32 %v717_v27, %v716_v26  ;;  %1148 = vmatprep.subr.mxu0 %v1211_v20  ;;  %v702_v44 = vadd.f32 %v701_v42, %v700_v23 }
 0x16e   :  { %v1174_v30 = vpop.eup %1173  ;;  %1149 = vmatpush3.msra.mxu0 %v1170_v24 }
 0x16f   :  { %v1176_v31 = vpop.eup %1175  ;;  %v707_v32 = vsel %vm637_vm2, %v1174_v30, 0.0  ;;  %1151 = vmatmul.mubr.msk.f32.vlgmr.msra.gmra.mxu0 %vm637_vm2, %v1074_v28  ;;  %v719_v43 = vrot.slane %v718_v29, 4  ;;  %v703_v46 = vrot.slane %v702_v44, 2 }
 0x170   :  { %v708_v33 = vsel %vm637_vm2, %v1176_v31, 0.0  ;;  %1140 = vmatpush3.msra.mxu1 %v1176_v31 }
 0x171   :  { %v709_v35 = vadd.f32 %v708_v33, %v707_v32  ;;  %1141 = vmatprep.subr.mxu1 %v1211_v20  ;;  %v720_v47 = vadd.f32 %v719_v43, %v718_v29  ;;  %v704_v48 = vadd.f32 %v703_v46, %v702_v44 }
 0x172   :  { %1142 = vmatpush3.msra.mxu1 %v1174_v30 }
 0x173   :  { %v1178_v36 = vpop.eup %1177  ;;  %1144 = vmatmul.mubr.msk.f32.vlgmr.msra.gmra.mxu1 %vm637_vm2, %v1073_v34  ;;  %1153 = vmatprep.subr.mxu1 %v1211_v20  ;;  %v710_v45 = vrot.slane %v709_v35, 4  ;;  %v721_v49 = vrot.slane %v720_v47, 2  ;;  %v705_v52 = vrot.slane %v704_v48, 1 }
 0x174   :  { %v1180_v37 = vpop.eup %1179  ;;  %v725_v38 = vsel %vm637_vm2, %v1178_v36, 0.0  ;;  %1157 = vmatprep.mubr.msk.f32.mxu1 %vm1212_vm1, %v1211_v20 }
 0x175   :  { %v726_v39 = vsel %vm637_vm2, %v1180_v37, 0.0  ;;  %1154 = vmatpush3.msra.mxu1 %v1180_v37  ;;  %v711_v50 = vadd.f32 %v710_v45, %v709_v35  ;;  %v722_v53 = vadd.f32 %v721_v49, %v720_v47  ;;  %v706_v56 = vadd.f32 %v705_v52, %v704_v48 }
 0x176   :  { %v727_v41 = vadd.f32 %v726_v39, %v725_v38  ;;  %1155 = vmatprep.subr.mxu1 %v1211_v20 }
 0x177   :  { %1156 = vmatpush3.msra.mxu1 %v1178_v36  ;;  %v712_v54 = vrot.slane %v711_v50, 2  ;;  %v723_v57 = vrot.slane %v722_v53, 1  ;;  %1181 = vrcp.f32 %v706_v56 }
 0x178   :  { %1158 = vmatmul.mubr.msk.f32.vlgmr.msra.gmra.mxu1 %vm637_vm2, %v1075_v40  ;;  %v728_v51 = vrot.slane %v727_v41, 4 }
 0x179   :  { %v713_v20 = vadd.f32 %v712_v54, %v711_v50  ;;  %v724_v59 = vadd.f32 %v723_v57, %v722_v53 }
 0x17a   :  { %v729_v55 = vadd.f32 %v728_v51, %v727_v41 }
 0x17b   :  { %v714_v60 = vrot.slane %v713_v20, 1  ;;  %1183 = vrcp.f32 %v724_v59 }
 0x17c   :  { %v730_v58 = vrot.slane %v729_v55, 2 }
 0x17d   :  { %v715_v62 = vadd.f32 %v714_v60, %v713_v20 }
 0x17e   :  { %v731_v61 = vadd.f32 %v730_v58, %v729_v55 }
 0x17f   :  { %1185 = vrcp.f32 %v715_v62 }
 0x180   :  { %v732_v63 = vrot.slane %v731_v61, 1 }
 0x182   :  { %v733_v0 = vadd.f32 %v732_v63, %v731_v61 }
 0x184   :  { %v1182_v1 = vpop.eup %1181  ;;  %1187 = vrcp.f32 %v733_v0 }
 0x188   :  { %v1184_v5 = vpop.eup %1183 }
 0x18c   :  { %v1186_v9 = vpop.eup %1185 }
 0x191   :  { %v1188_v13 = vpop.eup %1187 }
 0x22b   :  { %v803_v2 = vpop.f32.mrf.mxu0 }
 0x22c   :  { %v1030_v3 = vmul.f32 %v1182_v1, %v803_v2 }
 0x22d   :  { %v1138_v4 = vpop.f32.mrf.mxu0 }
 0x22e   :  { %1034 = vst.msk [vmem:[#allocation5] sm:$0xff] %vm637_vm2, %v1030_v3 }
 0x22f   :  { %v949_v6 = vpop.f32.mrf.mxu0 }
 0x230   :  { %v1032_v7 = vmul.f32 %v1184_v5, %v949_v6 }
 0x231   :  { %v1152_v8 = vpop.f32.mrf.mxu0 }
 0x232   :  { %1036 = vst.msk [vmem:[#allocation5 + $0x10] sm:$0xff] %vm637_vm2, %v1032_v7 }
 0x233   :  { %v876_v10 = vpop.f32.mrf.mxu1 }
 0x234   :  { %v1031_v11 = vmul.f32 %v1186_v9, %v876_v10 }
 0x235   :  { %v1145_v12 = vpop.f32.mrf.mxu1 }
 0x236   :  { %1035 = vst.msk [vmem:[#allocation5 + $0x8] sm:$0xff] %vm637_vm2, %v1031_v11 }
 0x238   :  { %v1022_v14 = vpop.f32.mrf.mxu1 }
 0x239   :  { %v1033_v15 = vmul.f32 %v1188_v13, %v1022_v14 }
 0x23a   :  { %v1159_v16 = vpop.f32.mrf.mxu1 }
 0x23b   :  { %1037 = vst.msk [vmem:[#allocation5 + $0x18] sm:$0xff] %vm637_vm2, %v1033_v15 }
 0x23c   :  { %1200 = shalt.err (!%p1197_p4)
}
 0x23d   :  { %s1214_s9 = smov 128   ;;  %s1215_s10 = smov 8  }
 0x23e   :  { %1049 = dma.vmem_to_hbm [thread:$0]  %s1044_s7, 512, %s1326_s3, [#allocation6], %s1214_s9, %s1214_s9, %s1215_s10  }
 0x23f   :  { %1209 = dma.done.wait [#allocation6], 512  }
 0x240   :  { %1210 = vsyncadd [#allocation6], 4294966784 }
 0x241   :  { %1053 = vsyncpa [#allocation6], 1 }

</bundles_post_ra>
